<compile_context>
chip_gen: v7x
topology: tpu7x:2x2x1
jax: 0.10.0
libtpu: 0.0.40
codegen_flags: <defaults>
</compile_context>

<pallas_src>
import jax
import jax.numpy as jnp
from jax import lax
from jax.experimental import pallas as pl
from jax.experimental.pallas import tpu as pltpu


# ----------------------------------------------------------------------------
# Pallas kernel: whole LSTM forward (all T steps) in one invocation
# ----------------------------------------------------------------------------
def _encoder_lstm_kernel(x_ref, wih_ref, whh_ref, b_ref, len_ref, out_ref):
    # x_ref: (T*B, I) time-major-flattened input
    # wih_ref: (I, 4H), whh_ref: (H, 4H), b_ref: (1, 4H), len_ref: (B, 1)
    # out_ref: (B, H)
    B, H = out_ref.shape
    TB = x_ref.shape[0]
    T = TB // B

    # One batched input projection for every timestep (single MXU push),
    # with the (b_ih + b_hh) bias folded in once (hoisted out of the loop).
    gx = jnp.dot(x_ref[...], wih_ref[...],
                 preferred_element_type=jnp.float32) + b_ref[...]  # (T*B, 4H)

    whh = whh_ref[...]            # (H, 4H) — loaded from VMEM once
    lens = len_ref[...]           # (B, 1) int32

    h = jnp.zeros((B, H), jnp.float32)
    c = jnp.zeros((B, H), jnp.float32)
    out = jnp.zeros((B, H), jnp.float32)

    # T is static & tiny: a Python loop == a fully unrolled recurrence, so
    # every slice below is static and the scheduler sees the whole chain.
    for t in range(T):
        # gates: (B, 4H) in PyTorch order [i, f, g, o]
        gates = gx[t * B:(t + 1) * B, :] + jnp.dot(
            h, whh, preferred_element_type=jnp.float32)

        # Full-width activations: 2 EUP pushes per step instead of 4 narrow.
        sig = jax.nn.sigmoid(gates)
        th = jnp.tanh(gates)

        i_g = sig[:, 0 * H:1 * H]
        f_g = sig[:, 1 * H:2 * H]
        g_g = th[:, 2 * H:3 * H]
        o_g = sig[:, 3 * H:4 * H]

        c = f_g * c + i_g * g_g
        h = o_g * jnp.tanh(c)

        # Keep h at the last valid timestep of each row (lengths[b] - 1),
        # matching pack/pad + gather semantics of the PyTorch module.
        out = jnp.where(lens == (t + 1), h, out)

    out_ref[...] = out


# ----------------------------------------------------------------------------
# Wrapper (glue): layout transforms + pallas_call
# ----------------------------------------------------------------------------
@jax.jit
def encoder_forward(x, lengths, w_ih, w_hh, b_ih, b_hh):
    """x: (B, T, I) float32 batch-first; lengths: (B,) int32. Returns (B, H)."""
    B, T, I = x.shape
    H = w_hh.shape[1]  # w_hh: (4H, H)

    # Time-major flatten so each step's (B, 4H) gate block is contiguous rows.
    x_flat = jnp.transpose(x, (1, 0, 2)).reshape(T * B, I)   # (T*B, I)
    wih_t = jnp.transpose(w_ih, (1, 0))                      # (I, 4H)
    whh_t = jnp.transpose(w_hh, (1, 0))                      # (H, 4H)
    bias = (b_ih + b_hh).reshape(1, 4 * H)                   # (1, 4H)
    len2d = lengths.astype(jnp.int32).reshape(B, 1)          # (B, 1)

    vmem_specs = [pl.BlockSpec(memory_space=pltpu.MemorySpace.VMEM)
                  for _ in range(5)]

    return pl.pallas_call(
        _encoder_lstm_kernel,
        out_shape=jax.ShapeDtypeStruct((B, H), jnp.float32),
        in_specs=vmem_specs,
        out_specs=pl.BlockSpec(memory_space=pltpu.MemorySpace.VMEM),
    )(x_flat, wih_t, whh_t, bias, len2d)


# ----------------------------------------------------------------------------
# Pure-JAX reference (mirrors PyTorch nn.LSTM + pack/pad + gather semantics)
# ----------------------------------------------------------------------------
def encoder_reference(x, lengths, w_ih, w_hh, b_ih, b_hh):
    B, T, I = x.shape
    H = w_hh.shape[1]

    def step(carry, x_t):
        h, c = carry
        gates = x_t @ w_ih.T + b_ih + h @ w_hh.T + b_hh
        i_g = jax.nn.sigmoid(gates[:, 0 * H:1 * H])
        f_g = jax.nn.sigmoid(gates[:, 1 * H:2 * H])
        g_g = jnp.tanh(gates[:, 2 * H:3 * H])
        o_g = jax.nn.sigmoid(gates[:, 3 * H:4 * H])
        c = f_g * c + i_g * g_g
        h = o_g * jnp.tanh(c)
        return (h, c), h

    init = (jnp.zeros((B, H), jnp.float32), jnp.zeros((B, H), jnp.float32))
    _, hs = lax.scan(step, init, jnp.transpose(x, (1, 0, 2)))  # (T, B, H)
    hs = jnp.transpose(hs, (1, 0, 2))                          # (B, T, H)
    return hs[jnp.arange(B), lengths - 1, :]


if __name__ == "__main__":
    # Encoder config: input_size=16, hidden_size=32, num_layers=1,
    # bidirectional=False, dropout=0.0, rnn_class='lstm'
    B, T, I, H = 8, 8, 16, 32

    key = jax.random.PRNGKey(0)
    k_x, k_wi, k_wh, k_bi, k_bh = jax.random.split(key, 5)

    # Deterministic parameter init (PyTorch LSTM: U(-1/sqrt(H), 1/sqrt(H)))
    bound = 1.0 / jnp.sqrt(jnp.float32(H))
    w_ih = jax.random.uniform(k_wi, (4 * H, I), jnp.float32, -bound, bound)
    w_hh = jax.random.uniform(k_wh, (4 * H, H), jnp.float32, -bound, bound)
    b_ih = jax.random.uniform(k_bi, (4 * H,), jnp.float32, -bound, bound)
    b_hh = jax.random.uniform(k_bh, (4 * H,), jnp.float32, -bound, bound)

    x = jax.random.normal(k_x, (B, T, I), jnp.float32)
    lengths = jnp.array([8, 5, 3, 8, 1, 6, 7, 2], dtype=jnp.int32)

    out = encoder_forward(x, lengths, w_ih, w_hh, b_ih, b_hh)
    out = jax.block_until_ready(out)

    ref = encoder_reference(x, lengths, w_ih, w_hh, b_ih, b_hh)
    assert out.shape == (B, H), out.shape
    assert jnp.allclose(out, ref, atol=1e-5, rtol=1e-5), \
        float(jnp.max(jnp.abs(out - ref)))

    print("KERNEL_OK")
</pallas_src>

<mosaic_0001>
module attributes {stable_mosaic.version = 11 : i64} {
  func.func @_encoder_lstm_kernel(%arg0: memref<64x16xf32, #tpu.memory_space<vmem>>, %arg1: memref<16x128xf32, #tpu.memory_space<vmem>>, %arg2: memref<32x128xf32, #tpu.memory_space<vmem>>, %arg3: memref<1x128xf32, #tpu.memory_space<vmem>>, %arg4: memref<8x1xi32, #tpu.memory_space<vmem>>, %arg5: memref<8x32xf32, #tpu.memory_space<vmem>>) attributes {dimension_semantics = [], scalar_prefetch = 0 : i64, scratch_operands = 0 : i64, tpu.core_type = #tpu.core_type<tc>} {
    %c0 = arith.constant 0 : index
    %c0_0 = arith.constant 0 : index
    %0 = vector.load %arg0[%c0, %c0_0] : memref<64x16xf32, #tpu.memory_space<vmem>>, vector<64x16xf32>
    %c0_1 = arith.constant 0 : index
    %c0_2 = arith.constant 0 : index
    %1 = vector.load %arg1[%c0_1, %c0_2] : memref<16x128xf32, #tpu.memory_space<vmem>>, vector<16x128xf32>
    %cst = arith.constant dense<0.000000e+00> : vector<64x128xf32>
    %2 = tpu.matmul %0, %1, %cst {dimension_numbers = #tpu.dot_dimension_numbers<[1], [0], [0], [1], [0, 0, 1, 1], [], []>} : vector<64x16xf32>, vector<16x128xf32>, vector<64x128xf32> -> vector<64x128xf32>
    %c0_3 = arith.constant 0 : index
    %c0_4 = arith.constant 0 : index
    %3 = vector.load %arg3[%c0_3, %c0_4] : memref<1x128xf32, #tpu.memory_space<vmem>>, vector<1x128xf32>
    %4 = vector.broadcast %3 : vector<1x128xf32> to vector<64x128xf32>
    %5 = arith.addf %2, %4 : vector<64x128xf32>
    %c0_5 = arith.constant 0 : index
    %c0_6 = arith.constant 0 : index
    %6 = vector.load %arg2[%c0_5, %c0_6] : memref<32x128xf32, #tpu.memory_space<vmem>>, vector<32x128xf32>
    %c0_7 = arith.constant 0 : index
    %c0_8 = arith.constant 0 : index
    %7 = vector.load %arg4[%c0_7, %c0_8] : memref<8x1xi32, #tpu.memory_space<vmem>>, vector<8x1xi32>
    %cst_9 = arith.constant 0.000000e+00 : f32
    %8 = vector.broadcast %cst_9 : f32 to vector<8x32xf32>
    %cst_10 = arith.constant 0.000000e+00 : f32
    %9 = vector.broadcast %cst_10 : f32 to vector<8x32xf32>
    %cst_11 = arith.constant 0.000000e+00 : f32
    %10 = vector.broadcast %cst_11 : f32 to vector<8x32xf32>
    %11 = vector.extract_strided_slice %5 {offsets = [0, 0], sizes = [8, 128], strides = [1, 1]} : vector<64x128xf32> to vector<8x128xf32>
    %cst_12 = arith.constant dense<0.000000e+00> : vector<8x128xf32>
    %12 = tpu.matmul %8, %6, %cst_12 {dimension_numbers = #tpu.dot_dimension_numbers<[1], [0], [0], [1], [0, 0, 1, 1], [], []>} : vector<8x32xf32>, vector<32x128xf32>, vector<8x128xf32> -> vector<8x128xf32>
    %13 = arith.addf %11, %12 : vector<8x128xf32>
    %14 = arith.negf %13 : vector<8x128xf32>
    %15 = math.exp %14 : vector<8x128xf32>
    %cst_13 = arith.constant 1.000000e+00 : f32
    %16 = vector.broadcast %cst_13 : f32 to vector<8x128xf32>
    %17 = arith.addf %16, %15 : vector<8x128xf32>
    %18 = arith.divf %16, %17 : vector<8x128xf32>
    %19 = math.tanh %13 : vector<8x128xf32>
    %20 = vector.extract_strided_slice %18 {offsets = [0, 0], sizes = [8, 32], strides = [1, 1]} : vector<8x128xf32> to vector<8x32xf32>
    %21 = vector.extract_strided_slice %18 {offsets = [0, 32], sizes = [8, 32], strides = [1, 1]} : vector<8x128xf32> to vector<8x32xf32>
    %22 = vector.extract_strided_slice %19 {offsets = [0, 64], sizes = [8, 32], strides = [1, 1]} : vector<8x128xf32> to vector<8x32xf32>
    %23 = vector.extract_strided_slice %18 {offsets = [0, 96], sizes = [8, 32], strides = [1, 1]} : vector<8x128xf32> to vector<8x32xf32>
    %24 = arith.mulf %21, %9 : vector<8x32xf32>
    %25 = arith.mulf %20, %22 : vector<8x32xf32>
    %26 = arith.addf %24, %25 : vector<8x32xf32>
    %27 = math.tanh %26 : vector<8x32xf32>
    %28 = arith.mulf %23, %27 : vector<8x32xf32>
    %c1_i32 = arith.constant 1 : i32
    %29 = vector.broadcast %c1_i32 : i32 to vector<8x1xi32>
    %30 = arith.cmpi eq, %7, %29 : vector<8x1xi32>
    %31 = vector.shape_cast %30 : vector<8x1xi1> to vector<8x1xi1>
    %32 = vector.broadcast %31 : vector<8x1xi1> to vector<8x32xi1>
    %33 = arith.select %32, %28, %10 : vector<8x32xi1>, vector<8x32xf32>
    %34 = vector.extract_strided_slice %5 {offsets = [8, 0], sizes = [8, 128], strides = [1, 1]} : vector<64x128xf32> to vector<8x128xf32>
    %cst_14 = arith.constant dense<0.000000e+00> : vector<8x128xf32>
    %35 = tpu.matmul %28, %6, %cst_14 {dimension_numbers = #tpu.dot_dimension_numbers<[1], [0], [0], [1], [0, 0, 1, 1], [], []>} : vector<8x32xf32>, vector<32x128xf32>, vector<8x128xf32> -> vector<8x128xf32>
    %36 = arith.addf %34, %35 : vector<8x128xf32>
    %37 = arith.negf %36 : vector<8x128xf32>
    %38 = math.exp %37 : vector<8x128xf32>
    %cst_15 = arith.constant 1.000000e+00 : f32
    %39 = vector.broadcast %cst_15 : f32 to vector<8x128xf32>
    %40 = arith.addf %39, %38 : vector<8x128xf32>
    %41 = arith.divf %39, %40 : vector<8x128xf32>
    %42 = math.tanh %36 : vector<8x128xf32>
    %43 = vector.extract_strided_slice %41 {offsets = [0, 0], sizes = [8, 32], strides = [1, 1]} : vector<8x128xf32> to vector<8x32xf32>
    %44 = vector.extract_strided_slice %41 {offsets = [0, 32], sizes = [8, 32], strides = [1, 1]} : vector<8x128xf32> to vector<8x32xf32>
    %45 = vector.extract_strided_slice %42 {offsets = [0, 64], sizes = [8, 32], strides = [1, 1]} : vector<8x128xf32> to vector<8x32xf32>
    %46 = vector.extract_strided_slice %41 {offsets = [0, 96], sizes = [8, 32], strides = [1, 1]} : vector<8x128xf32> to vector<8x32xf32>
    %47 = arith.mulf %44, %26 : vector<8x32xf32>
    %48 = arith.mulf %43, %45 : vector<8x32xf32>
    %49 = arith.addf %47, %48 : vector<8x32xf32>
    %50 = math.tanh %49 : vector<8x32xf32>
    %51 = arith.mulf %46, %50 : vector<8x32xf32>
    %c2_i32 = arith.constant 2 : i32
    %52 = vector.broadcast %c2_i32 : i32 to vector<8x1xi32>
    %53 = arith.cmpi eq, %7, %52 : vector<8x1xi32>
    %54 = vector.shape_cast %53 : vector<8x1xi1> to vector<8x1xi1>
    %55 = vector.broadcast %54 : vector<8x1xi1> to vector<8x32xi1>
    %56 = arith.select %55, %51, %33 : vector<8x32xi1>, vector<8x32xf32>
    %57 = vector.extract_strided_slice %5 {offsets = [16, 0], sizes = [8, 128], strides = [1, 1]} : vector<64x128xf32> to vector<8x128xf32>
    %cst_16 = arith.constant dense<0.000000e+00> : vector<8x128xf32>
    %58 = tpu.matmul %51, %6, %cst_16 {dimension_numbers = #tpu.dot_dimension_numbers<[1], [0], [0], [1], [0, 0, 1, 1], [], []>} : vector<8x32xf32>, vector<32x128xf32>, vector<8x128xf32> -> vector<8x128xf32>
    %59 = arith.addf %57, %58 : vector<8x128xf32>
    %60 = arith.negf %59 : vector<8x128xf32>
    %61 = math.exp %60 : vector<8x128xf32>
    %cst_17 = arith.constant 1.000000e+00 : f32
    %62 = vector.broadcast %cst_17 : f32 to vector<8x128xf32>
    %63 = arith.addf %62, %61 : vector<8x128xf32>
    %64 = arith.divf %62, %63 : vector<8x128xf32>
    %65 = math.tanh %59 : vector<8x128xf32>
    %66 = vector.extract_strided_slice %64 {offsets = [0, 0], sizes = [8, 32], strides = [1, 1]} : vector<8x128xf32> to vector<8x32xf32>
    %67 = vector.extract_strided_slice %64 {offsets = [0, 32], sizes = [8, 32], strides = [1, 1]} : vector<8x128xf32> to vector<8x32xf32>
    %68 = vector.extract_strided_slice %65 {offsets = [0, 64], sizes = [8, 32], strides = [1, 1]} : vector<8x128xf32> to vector<8x32xf32>
    %69 = vector.extract_strided_slice %64 {offsets = [0, 96], sizes = [8, 32], strides = [1, 1]} : vector<8x128xf32> to vector<8x32xf32>
    %70 = arith.mulf %67, %49 : vector<8x32xf32>
    %71 = arith.mulf %66, %68 : vector<8x32xf32>
    %72 = arith.addf %70, %71 : vector<8x32xf32>
    %73 = math.tanh %72 : vector<8x32xf32>
    %74 = arith.mulf %69, %73 : vector<8x32xf32>
    %c3_i32 = arith.constant 3 : i32
    %75 = vector.broadcast %c3_i32 : i32 to vector<8x1xi32>
    %76 = arith.cmpi eq, %7, %75 : vector<8x1xi32>
    %77 = vector.shape_cast %76 : vector<8x1xi1> to vector<8x1xi1>
    %78 = vector.broadcast %77 : vector<8x1xi1> to vector<8x32xi1>
    %79 = arith.select %78, %74, %56 : vector<8x32xi1>, vector<8x32xf32>
    %80 = vector.extract_strided_slice %5 {offsets = [24, 0], sizes = [8, 128], strides = [1, 1]} : vector<64x128xf32> to vector<8x128xf32>
    %cst_18 = arith.constant dense<0.000000e+00> : vector<8x128xf32>
    %81 = tpu.matmul %74, %6, %cst_18 {dimension_numbers = #tpu.dot_dimension_numbers<[1], [0], [0], [1], [0, 0, 1, 1], [], []>} : vector<8x32xf32>, vector<32x128xf32>, vector<8x128xf32> -> vector<8x128xf32>
    %82 = arith.addf %80, %81 : vector<8x128xf32>
    %83 = arith.negf %82 : vector<8x128xf32>
    %84 = math.exp %83 : vector<8x128xf32>
    %cst_19 = arith.constant 1.000000e+00 : f32
    %85 = vector.broadcast %cst_19 : f32 to vector<8x128xf32>
    %86 = arith.addf %85, %84 : vector<8x128xf32>
    %87 = arith.divf %85, %86 : vector<8x128xf32>
    %88 = math.tanh %82 : vector<8x128xf32>
    %89 = vector.extract_strided_slice %87 {offsets = [0, 0], sizes = [8, 32], strides = [1, 1]} : vector<8x128xf32> to vector<8x32xf32>
    %90 = vector.extract_strided_slice %87 {offsets = [0, 32], sizes = [8, 32], strides = [1, 1]} : vector<8x128xf32> to vector<8x32xf32>
    %91 = vector.extract_strided_slice %88 {offsets = [0, 64], sizes = [8, 32], strides = [1, 1]} : vector<8x128xf32> to vector<8x32xf32>
    %92 = vector.extract_strided_slice %87 {offsets = [0, 96], sizes = [8, 32], strides = [1, 1]} : vector<8x128xf32> to vector<8x32xf32>
    %93 = arith.mulf %90, %72 : vector<8x32xf32>
    %94 = arith.mulf %89, %91 : vector<8x32xf32>
    %95 = arith.addf %93, %94 : vector<8x32xf32>
    %96 = math.tanh %95 : vector<8x32xf32>
    %97 = arith.mulf %92, %96 : vector<8x32xf32>
    %c4_i32 = arith.constant 4 : i32
    %98 = vector.broadcast %c4_i32 : i32 to vector<8x1xi32>
    %99 = arith.cmpi eq, %7, %98 : vector<8x1xi32>
    %100 = vector.shape_cast %99 : vector<8x1xi1> to vector<8x1xi1>
    %101 = vector.broadcast %100 : vector<8x1xi1> to vector<8x32xi1>
    %102 = arith.select %101, %97, %79 : vector<8x32xi1>, vector<8x32xf32>
    %103 = vector.extract_strided_slice %5 {offsets = [32, 0], sizes = [8, 128], strides = [1, 1]} : vector<64x128xf32> to vector<8x128xf32>
    %cst_20 = arith.constant dense<0.000000e+00> : vector<8x128xf32>
    %104 = tpu.matmul %97, %6, %cst_20 {dimension_numbers = #tpu.dot_dimension_numbers<[1], [0], [0], [1], [0, 0, 1, 1], [], []>} : vector<8x32xf32>, vector<32x128xf32>, vector<8x128xf32> -> vector<8x128xf32>
    %105 = arith.addf %103, %104 : vector<8x128xf32>
    %106 = arith.negf %105 : vector<8x128xf32>
    %107 = math.exp %106 : vector<8x128xf32>
    %cst_21 = arith.constant 1.000000e+00 : f32
    %108 = vector.broadcast %cst_21 : f32 to vector<8x128xf32>
    %109 = arith.addf %108, %107 : vector<8x128xf32>
    %110 = arith.divf %108, %109 : vector<8x128xf32>
    %111 = math.tanh %105 : vector<8x128xf32>
    %112 = vector.extract_strided_slice %110 {offsets = [0, 0], sizes = [8, 32], strides = [1, 1]} : vector<8x128xf32> to vector<8x32xf32>
    %113 = vector.extract_strided_slice %110 {offsets = [0, 32], sizes = [8, 32], strides = [1, 1]} : vector<8x128xf32> to vector<8x32xf32>
    %114 = vector.extract_strided_slice %111 {offsets = [0, 64], sizes = [8, 32], strides = [1, 1]} : vector<8x128xf32> to vector<8x32xf32>
    %115 = vector.extract_strided_slice %110 {offsets = [0, 96], sizes = [8, 32], strides = [1, 1]} : vector<8x128xf32> to vector<8x32xf32>
    %116 = arith.mulf %113, %95 : vector<8x32xf32>
    %117 = arith.mulf %112, %114 : vector<8x32xf32>
    %118 = arith.addf %116, %117 : vector<8x32xf32>
    %119 = math.tanh %118 : vector<8x32xf32>
    %120 = arith.mulf %115, %119 : vector<8x32xf32>
    %c5_i32 = arith.constant 5 : i32
    %121 = vector.broadcast %c5_i32 : i32 to vector<8x1xi32>
    %122 = arith.cmpi eq, %7, %121 : vector<8x1xi32>
    %123 = vector.shape_cast %122 : vector<8x1xi1> to vector<8x1xi1>
    %124 = vector.broadcast %123 : vector<8x1xi1> to vector<8x32xi1>
    %125 = arith.select %124, %120, %102 : vector<8x32xi1>, vector<8x32xf32>
    %126 = vector.extract_strided_slice %5 {offsets = [40, 0], sizes = [8, 128], strides = [1, 1]} : vector<64x128xf32> to vector<8x128xf32>
    %cst_22 = arith.constant dense<0.000000e+00> : vector<8x128xf32>
    %127 = tpu.matmul %120, %6, %cst_22 {dimension_numbers = #tpu.dot_dimension_numbers<[1], [0], [0], [1], [0, 0, 1, 1], [], []>} : vector<8x32xf32>, vector<32x128xf32>, vector<8x128xf32> -> vector<8x128xf32>
    %128 = arith.addf %126, %127 : vector<8x128xf32>
    %129 = arith.negf %128 : vector<8x128xf32>
    %130 = math.exp %129 : vector<8x128xf32>
    %cst_23 = arith.constant 1.000000e+00 : f32
    %131 = vector.broadcast %cst_23 : f32 to vector<8x128xf32>
    %132 = arith.addf %131, %130 : vector<8x128xf32>
    %133 = arith.divf %131, %132 : vector<8x128xf32>
    %134 = math.tanh %128 : vector<8x128xf32>
    %135 = vector.extract_strided_slice %133 {offsets = [0, 0], sizes = [8, 32], strides = [1, 1]} : vector<8x128xf32> to vector<8x32xf32>
    %136 = vector.extract_strided_slice %133 {offsets = [0, 32], sizes = [8, 32], strides = [1, 1]} : vector<8x128xf32> to vector<8x32xf32>
    %137 = vector.extract_strided_slice %134 {offsets = [0, 64], sizes = [8, 32], strides = [1, 1]} : vector<8x128xf32> to vector<8x32xf32>
    %138 = vector.extract_strided_slice %133 {offsets = [0, 96], sizes = [8, 32], strides = [1, 1]} : vector<8x128xf32> to vector<8x32xf32>
    %139 = arith.mulf %136, %118 : vector<8x32xf32>
    %140 = arith.mulf %135, %137 : vector<8x32xf32>
    %141 = arith.addf %139, %140 : vector<8x32xf32>
    %142 = math.tanh %141 : vector<8x32xf32>
    %143 = arith.mulf %138, %142 : vector<8x32xf32>
    %c6_i32 = arith.constant 6 : i32
    %144 = vector.broadcast %c6_i32 : i32 to vector<8x1xi32>
    %145 = arith.cmpi eq, %7, %144 : vector<8x1xi32>
    %146 = vector.shape_cast %145 : vector<8x1xi1> to vector<8x1xi1>
    %147 = vector.broadcast %146 : vector<8x1xi1> to vector<8x32xi1>
    %148 = arith.select %147, %143, %125 : vector<8x32xi1>, vector<8x32xf32>
    %149 = vector.extract_strided_slice %5 {offsets = [48, 0], sizes = [8, 128], strides = [1, 1]} : vector<64x128xf32> to vector<8x128xf32>
    %cst_24 = arith.constant dense<0.000000e+00> : vector<8x128xf32>
    %150 = tpu.matmul %143, %6, %cst_24 {dimension_numbers = #tpu.dot_dimension_numbers<[1], [0], [0], [1], [0, 0, 1, 1], [], []>} : vector<8x32xf32>, vector<32x128xf32>, vector<8x128xf32> -> vector<8x128xf32>
    %151 = arith.addf %149, %150 : vector<8x128xf32>
    %152 = arith.negf %151 : vector<8x128xf32>
    %153 = math.exp %152 : vector<8x128xf32>
    %cst_25 = arith.constant 1.000000e+00 : f32
    %154 = vector.broadcast %cst_25 : f32 to vector<8x128xf32>
    %155 = arith.addf %154, %153 : vector<8x128xf32>
    %156 = arith.divf %154, %155 : vector<8x128xf32>
    %157 = math.tanh %151 : vector<8x128xf32>
    %158 = vector.extract_strided_slice %156 {offsets = [0, 0], sizes = [8, 32], strides = [1, 1]} : vector<8x128xf32> to vector<8x32xf32>
    %159 = vector.extract_strided_slice %156 {offsets = [0, 32], sizes = [8, 32], strides = [1, 1]} : vector<8x128xf32> to vector<8x32xf32>
    %160 = vector.extract_strided_slice %157 {offsets = [0, 64], sizes = [8, 32], strides = [1, 1]} : vector<8x128xf32> to vector<8x32xf32>
    %161 = vector.extract_strided_slice %156 {offsets = [0, 96], sizes = [8, 32], strides = [1, 1]} : vector<8x128xf32> to vector<8x32xf32>
    %162 = arith.mulf %159, %141 : vector<8x32xf32>
    %163 = arith.mulf %158, %160 : vector<8x32xf32>
    %164 = arith.addf %162, %163 : vector<8x32xf32>
    %165 = math.tanh %164 : vector<8x32xf32>
    %166 = arith.mulf %161, %165 : vector<8x32xf32>
    %c7_i32 = arith.constant 7 : i32
    %167 = vector.broadcast %c7_i32 : i32 to vector<8x1xi32>
    %168 = arith.cmpi eq, %7, %167 : vector<8x1xi32>
    %169 = vector.shape_cast %168 : vector<8x1xi1> to vector<8x1xi1>
    %170 = vector.broadcast %169 : vector<8x1xi1> to vector<8x32xi1>
    %171 = arith.select %170, %166, %148 : vector<8x32xi1>, vector<8x32xf32>
    %172 = vector.extract_strided_slice %5 {offsets = [56, 0], sizes = [8, 128], strides = [1, 1]} : vector<64x128xf32> to vector<8x128xf32>
    %cst_26 = arith.constant dense<0.000000e+00> : vector<8x128xf32>
    %173 = tpu.matmul %166, %6, %cst_26 {dimension_numbers = #tpu.dot_dimension_numbers<[1], [0], [0], [1], [0, 0, 1, 1], [], []>} : vector<8x32xf32>, vector<32x128xf32>, vector<8x128xf32> -> vector<8x128xf32>
    %174 = arith.addf %172, %173 : vector<8x128xf32>
    %175 = arith.negf %174 : vector<8x128xf32>
    %176 = math.exp %175 : vector<8x128xf32>
    %cst_27 = arith.constant 1.000000e+00 : f32
    %177 = vector.broadcast %cst_27 : f32 to vector<8x128xf32>
    %178 = arith.addf %177, %176 : vector<8x128xf32>
    %179 = arith.divf %177, %178 : vector<8x128xf32>
    %180 = math.tanh %174 : vector<8x128xf32>
    %181 = vector.extract_strided_slice %179 {offsets = [0, 0], sizes = [8, 32], strides = [1, 1]} : vector<8x128xf32> to vector<8x32xf32>
    %182 = vector.extract_strided_slice %179 {offsets = [0, 32], sizes = [8, 32], strides = [1, 1]} : vector<8x128xf32> to vector<8x32xf32>
    %183 = vector.extract_strided_slice %180 {offsets = [0, 64], sizes = [8, 32], strides = [1, 1]} : vector<8x128xf32> to vector<8x32xf32>
    %184 = vector.extract_strided_slice %179 {offsets = [0, 96], sizes = [8, 32], strides = [1, 1]} : vector<8x128xf32> to vector<8x32xf32>
    %185 = arith.mulf %182, %164 : vector<8x32xf32>
    %186 = arith.mulf %181, %183 : vector<8x32xf32>
    %187 = arith.addf %185, %186 : vector<8x32xf32>
    %188 = math.tanh %187 : vector<8x32xf32>
    %189 = arith.mulf %184, %188 : vector<8x32xf32>
    %c8_i32 = arith.constant 8 : i32
    %190 = vector.broadcast %c8_i32 : i32 to vector<8x1xi32>
    %191 = arith.cmpi eq, %7, %190 : vector<8x1xi32>
    %192 = vector.shape_cast %191 : vector<8x1xi1> to vector<8x1xi1>
    %193 = vector.broadcast %192 : vector<8x1xi1> to vector<8x32xi1>
    %194 = arith.select %193, %189, %171 : vector<8x32xi1>, vector<8x32xf32>
    %c0_28 = arith.constant 0 : index
    %c0_29 = arith.constant 0 : index
    %195 = vector.load %arg5[%c0_28, %c0_29] : memref<8x32xf32, #tpu.memory_space<vmem>>, vector<8x32xf32>
    tpu.vector_store %arg5[%c0_28, %c0_29], %194 {strides = array<i32>} : memref<8x32xf32, #tpu.memory_space<vmem>>, vector<8x32xf32>,
    return
  }
}

</mosaic_0001>

<bundles_post_ra>
// kernel: encoder_forward.1
= control target key start
LH: loop header
LB: loop body
LE: loop exit
PB: predicated region body
PF: predicated region fallthrough
CT: control target
= control target key end

     0   :  { %vm38_vm0 = vcmask 130048   ;;  %v1374_v3 = vmov 0.0|0.0   ;;  %vm1375_vm1 = vmmov 0   ;;  %v1376_v10 = vmov 0.0   ;;  %s1622_s0 = inlined_call_operand.vmem [shape: f32[64,16], index: 0, kind: input, shape index: {}]   ;;  %s1623_s1 = inlined_call_operand.vmem [shape: f32[16,128], index: 1, kind: input, shape index: {}]   ;;  %s1624_s2 = inlined_call_operand.vmem [shape: f32[32,128], index: 2, kind: input, shape index: {}]   ;;  %s1625_s3 = inlined_call_operand.vmem [shape: f32[1,128], index: 3, kind: input, shape index: {}]   ;;  %s1626_s4 = inlined_call_operand.vmem [shape: s32[8,1], index: 4, kind: input, shape index: {}]   ;;  %s1627_s5 = inlined_call_operand.hbm [shape: f32[8,32], index: 5, kind: output, shape index: {}]  }
   0x1   :  { %v29_v0 = vld [vmem:[%s1623_s1] sm:$0xff]  ;;  %v30_v1 = vld [vmem:[%s1623_s1 + $0x8] sm:$0xff]  ;;  %1229 = vmatprep.subr.bf16.mxu1 %v1374_v3  ;;  %v170_v8 = vld [vmem:[%s1624_s2 + $0x10] sm:$0xff]  ;;  %1145 = vmatprep.mubr.msk.f32.mxu1 %vm1375_vm1, %v1376_v10 }
   0x2   :  { %v168_v2 = vld [vmem:[%s1624_s2] sm:$0xff]  ;;  %v1225_v4 = vpack.c.bf16 %v30_v1, %v29_v0  ;;  %v169_v5 = vld [vmem:[%s1624_s2 + $0x8] sm:$0xff]  ;;  %v171_v9 = vld [vmem:[%s1624_s2 + $0x18] sm:$0xff] }
   0x3   :  { %v21_v6 = vld [vmem:[%s1622_s0] sm:$0xff]  ;;  %v1427_v7 = vpack.c.bf16 %v169_v5, %v168_v2 }
   0x4   :  { %1125 = vmatprep.mubr.msk.f32.mxu0 %vm38_vm0, %v21_v6 }
   0x5   :  { %10 = vsyncpa [#allocation3], 0  ;;  %1226 = vmatprep.subr.bf16.mxu0 %v1225_v4  ;;  %1231 = vmatpush3.bf16.msra.mxu1 %v1427_v7  ;;  %v22_v11 = vld [vmem:[%s1622_s0 + $0x8] sm:$0xff]  ;;  %v1442_v12 = vpack.c.bf16 %v171_v9, %v170_v8  ;;  %v1463_v13 = vld [vmem:[%s1625_s3] ss:$0 sm:$0xff]  ;;  %s1377_s9 = smov 64  }
   0x6   :  { %1228 = vmatpush3.bf16.msra.mxu0 %v1225_v4  ;;  %1232 = vmatprep.subr.bf16.mxu1 %v1374_v3  ;;  %s1378_s3 = smov 32   ;;  %vm173_vm2 = vcmask 261120   ;;  %v23_v48 = vld [vmem:[%s1622_s0 + $0x10] sm:$0xff]  ;;  %v24_v49 = vld [vmem:[%s1622_s0 + $0x18] sm:$0xff]  ;;  %v25_v50 = vld [vmem:[%s1622_s0 + $0x20] sm:$0xff] }
   0x7   :  { %1241 = vmatprep.subr.bf16.mxu0 %v1374_v3  ;;  %v26_v51 = vld [vmem:[%s1622_s0 + $0x28] sm:$0xff]  ;;  %v27_v52 = vld [vmem:[%s1622_s0 + $0x30] sm:$0xff]  ;;  %v28_v53 = vld [vmem:[%s1622_s0 + $0x38] sm:$0xff] }
   0x9   :  { %1126 = vmatmul.mubr.msk.f32.vlgmr.msra.gmra.mrb[0].mxu0 %vm38_vm0, %v22_v11  ;;  %1234 = vmatpush3.bf16.msra.mxu1 %v1442_v12 }
   0xa   :  { %1243 = vmatpush3.bf16.msra.mxu0 %v1427_v7  ;;  %1235 = vmatprep.subr.bf16.mxu1 %v1374_v3 }
   0xb   :  { %1244 = vmatprep.subr.bf16.mxu0 %v1374_v3  ;;  %1128 = vmatprep.mubr.msk.f32.mxu0 %vm38_vm0, %v23_v48 }
   0xc   :  { %1146 = vmatmul.mubr.f32.vlgmr.msra.gmra.mrb[0].mxu1 %v1376_v10 }
   0xd   :  { %1237 = vmatpush3.bf16.msra.mxu1 %v1427_v7  ;;  %1156 = vmatprep.mubr.msk.f32.mxu1 %vm1375_vm1, %v1376_v10 }
   0xe   :  { %1238 = vmatprep.subr.bf16.mxu1 %v1374_v3  ;;  %1246 = vmatpush3.bf16.msra.mxu0 %v1442_v12 }
   0xf   :  { %1253 = vmatprep.subr.bf16.mxu0 %v1374_v3  ;;  %1129 = vmatmul.mubr.msk.f32.gmra.mrb[2].mxu0 %vm38_vm0, %v24_v49 }
  0x10   :  { %1131 = vmatprep.mubr.msk.f32.mxu0 %vm38_vm0, %v25_v50 }
  0x11   :  { %1240 = vmatpush3.bf16.msra.mxu1 %v1442_v12 }
  0x12   :  { %1247 = vmatprep.subr.bf16.mxu1 %v1374_v3 }
  0x13   :  { %1132 = vmatmul.mubr.msk.f32.gmra.mrb[4].mxu0 %vm38_vm0, %v26_v51 }
  0x14   :  { %1134 = vmatprep.mubr.msk.f32.mxu0 %vm38_vm0, %v27_v52 }
  0x17   :  { %1135 = vmatmul.mubr.msk.f32.gmra.mrb[6].mxu0 %vm38_vm0, %v28_v53 }
  0x18   :  { %1167 = vmatprep.mubr.msk.f32.mxu0 %vm1375_vm1, %v1376_v10 }
  0xdc   :  { %v1127_v14 = vpop.f32.mrb[0].mxu0 }
  0xdd   :  { %v129_v15 = vpop.f32.mrb[1].mxu0  ;;  %v135_v34 = vadd.f32 %v1127_v14, %v1463_v13 }
  0xde   :  { %v130_v16 = vadd.f32 %v1463_v13, %v129_v15 }
  0xdf   :  { %v243_v17 = vpop.f32.mrb[0].mxu1 }
  0xe0   :  { %v247_v18 = vadd.f32 %v243_v17, %v130_v16  ;;  %v1147_v19 = vpop.f32.mrb[1].mxu1 }
  0xe2   :  { %1286 = vtanh.f32 %v247_v18  ;;  %v1056_v21 = vmul.f32 -1.442695, %v247_v18  ;;  %v1130_v57 = vpop.f32.mrb[2].mxu0 }
  0xe3   :  { %v139_v58 = vpop.f32.mrb[3].mxu0 }
  0xe4   :  { %1288 = vpow2.f32 %v1056_v21  ;;  %v140_v0 = vadd.f32 %v1463_v13, %v139_v58 }
  0xe6   :  { %v1514_v59 = vpop.f32.mrb[4].mxu0 }
  0xe7   :  { %v1516_v60 = vpop.f32.mrb[5].mxu0 }
  0xea   :  { %v1518_v61 = vpop.f32.mrb[6].mxu0 }
  0xeb   :  { %v1520_v62 = vpop.f32.mrb[7].mxu0 }
  0xec   :  { %v1287_v20 = vpop.eup %1286 }
  0xed   :  { %257 = vrot.lane.b32.xlu0 %v1287_v20, %s1377_s9 }
  0xee   :  { %v1289_v22 = vpop.eup %1288 }
  0xef   :  { %v251_v23 = vadd.f32 1.0, %v1289_v22 }
  0xf1   :  { %1290 = vrcp.f32 %v251_v23  ;;  %v145_v23 = vadd.f32 %v1130_v57, %v1463_v13 }
  0xfb   :  { %v1291_v24 = vpop.eup %1290 }
  0xfc   :  { %v255_v27 = vmul.f32 0.0, %v1291_v24 }
 0x15f   :  { %v258_v25 = vpop.permute.xlu0 %257 }
 0x160   :  { %v260_v26 = vmul.f32 %v1291_v24, %v258_v25 }
 0x162   :  { %262 = vrot.lane.b32.xlu0 %v260_v26, %s1378_s3 }
 0x1d4   :  { %v263_v28 = vpop.permute.xlu0 %262 }
 0x1d5   :  { %v265_v29 = vadd.f32 %v263_v28, %v255_v27 }
 0x1d7   :  { %1292 = vtanh.f32 %v265_v29 }
 0x1e1   :  { %v1293_v30 = vpop.eup %1292 }
 0x1e2   :  { %268 = vrot.lane.b32.xlu1 %v1293_v30, %s1377_s9 }
 0x254   :  { %v269_v31 = vpop.permute.xlu1 %268 }
 0x255   :  { %v1469_v32 = vmul.f32 %v1291_v24, %v269_v31 }
 0x257   :  { %280 = vrot.lane.b32.xlu1 %v1469_v32, %s1378_s3 }
 0x2c9   :  { %v281_v33 = vpop.permute.xlu1 %280 }
 0x2ca   :  { %1157 = vmatmul.mubr.msk.f32.vlgmr.msra.gmra.mrb[2].mxu1 %vm173_vm2, %v281_v33 }
 0x2cb   :  { %1249 = vmatpush3.bf16.msra.mxu1 %v1427_v7  ;;  %1178 = vmatprep.mubr.msk.f32.mxu1 %vm1375_vm1, %v1376_v10 }
 0x2cc   :  { %1250 = vmatprep.subr.bf16.mxu1 %v1374_v3 }
 0x2cf   :  { %1252 = vmatpush3.bf16.msra.mxu1 %v1442_v12 }
 0x2d0   :  { %1259 = vmatprep.subr.bf16.mxu1 %v1374_v3 }
 0x39d   :  { %v350_v35 = vpop.f32.mrb[2].mxu1 }
 0x39e   :  { %v354_v36 = vadd.f32 %v350_v35, %v135_v34  ;;  %v1158_v37 = vpop.f32.mrb[3].mxu1 }
 0x3a0   :  { %1294 = vtanh.f32 %v354_v36  ;;  %v1058_v39 = vmul.f32 -1.442695, %v354_v36 }
 0x3a2   :  { %1296 = vpow2.f32 %v1058_v39 }
 0x3aa   :  { %v1295_v38 = vpop.eup %1294 }
 0x3ab   :  { %364 = vrot.lane.b32.xlu0 %v1295_v38, %s1377_s9 }
 0x3ac   :  { %v1297_v40 = vpop.eup %1296 }
 0x3ad   :  { %v358_v41 = vadd.f32 1.0, %v1297_v40 }
 0x3af   :  { %1298 = vrcp.f32 %v358_v41 }
 0x3b9   :  { %v1299_v42 = vpop.eup %1298 }
 0x3ba   :  { %v362_v45 = vmul.f32 %v1299_v42, %v265_v29 }
 0x41d   :  { %v365_v43 = vpop.permute.xlu0 %364 }
 0x41e   :  { %v367_v44 = vmul.f32 %v1299_v42, %v365_v43 }
 0x420   :  { %369 = vrot.lane.b32.xlu1 %v367_v44, %s1378_s3 }
 0x492   :  { %v370_v46 = vpop.permute.xlu1 %369 }
 0x493   :  { %v372_v47 = vadd.f32 %v370_v46, %v362_v45 }
 0x495   :  { %1300 = vtanh.f32 %v372_v47 }
 0x49f   :  { %v1301_v54 = vpop.eup %1300 }
 0x4a0   :  { %375 = vrot.lane.b32.xlu0 %v1301_v54, %s1377_s9 }
 0x512   :  { %v376_v55 = vpop.permute.xlu0 %375 }
 0x513   :  { %v1510_v56 = vmul.f32 %v1299_v42, %v376_v55  ;;  %v150_v42 = vadd.f32 %v1463_v13, %v1516_v60 }
 0x515   :  { %387 = vrot.lane.b32.xlu1 %v1510_v56, %s1378_s3 }
 0x587   :  { %v388_v63 = vpop.permute.xlu1 %387 }
 0x588   :  { %1168 = vmatmul.mubr.msk.f32.vlgmr.msra.gmra.mrb[8].mxu0 %vm173_vm2, %v388_v63 }
 0x589   :  { %1255 = vmatpush3.bf16.msra.mxu0 %v1427_v7  ;;  %1189 = vmatprep.mubr.msk.f32.mxu0 %vm1375_vm1, %v1376_v10 }
 0x58a   :  { %1256 = vmatprep.subr.bf16.mxu0 %v1374_v3 }
 0x58d   :  { %1258 = vmatpush3.bf16.msra.mxu0 %v1442_v12 }
 0x58e   :  { %1265 = vmatprep.subr.bf16.mxu0 %v1374_v3 }
 0x65b   :  { %v457_v1 = vpop.f32.mrb[8].mxu0 }
 0x65c   :  { %v461_v2 = vadd.f32 %v457_v1, %v140_v0  ;;  %v1169_v4 = vpop.f32.mrb[9].mxu0  ;;  %v155_v0 = vadd.f32 %v1514_v59, %v1463_v13 }
 0x65e   :  { %1302 = vtanh.f32 %v461_v2  ;;  %v1060_v6 = vmul.f32 -1.442695, %v461_v2 }
 0x660   :  { %1304 = vpow2.f32 %v1060_v6 }
 0x668   :  { %v1303_v5 = vpop.eup %1302 }
 0x669   :  { %471 = vrot.lane.b32.xlu0 %v1303_v5, %s1377_s9 }
 0x66a   :  { %v1305_v8 = vpop.eup %1304 }
 0x66b   :  { %v465_v9 = vadd.f32 1.0, %v1305_v8 }
 0x66d   :  { %1306 = vrcp.f32 %v465_v9 }
 0x677   :  { %v1307_v11 = vpop.eup %1306 }
 0x678   :  { %v469_v16 = vmul.f32 %v1307_v11, %v372_v47 }
 0x6db   :  { %v472_v14 = vpop.permute.xlu0 %471 }
 0x6dc   :  { %v474_v15 = vmul.f32 %v1307_v11, %v472_v14 }
 0x6de   :  { %476 = vrot.lane.b32.xlu1 %v474_v15, %s1378_s3 }
 0x750   :  { %v477_v17 = vpop.permute.xlu1 %476 }
 0x751   :  { %v479_v18 = vadd.f32 %v477_v17, %v469_v16 }
 0x753   :  { %1308 = vtanh.f32 %v479_v18 }
 0x75d   :  { %v1309_v19 = vpop.eup %1308 }
 0x75e   :  { %482 = vrot.lane.b32.xlu0 %v1309_v19, %s1377_s9 }
 0x7d0   :  { %v483_v20 = vpop.permute.xlu0 %482 }
 0x7d1   :  { %v1533_v21 = vmul.f32 %v1307_v11, %v483_v20 }
 0x7d3   :  { %494 = vrot.lane.b32.xlu1 %v1533_v21, %s1378_s3 }
 0x845   :  { %v495_v22 = vpop.permute.xlu1 %494 }
 0x846   :  { %1179 = vmatmul.mubr.msk.f32.vlgmr.msra.gmra.mrb[4].mxu1 %vm173_vm2, %v495_v22 }
 0x847   :  { %1261 = vmatpush3.bf16.msra.mxu1 %v1427_v7  ;;  %1200 = vmatprep.mubr.msk.f32.mxu1 %vm1375_vm1, %v1376_v10 }
 0x848   :  { %1262 = vmatprep.subr.bf16.mxu1 %v1374_v3 }
 0x84b   :  { %1264 = vmatpush3.bf16.msra.mxu1 %v1442_v12 }
 0x84c   :  { %1271 = vmatprep.subr.bf16.mxu1 %v1374_v3 }
 0x919   :  { %v564_v24 = vpop.f32.mrb[4].mxu1 }
 0x91a   :  { %v568_v25 = vadd.f32 %v564_v24, %v145_v23  ;;  %v1180_v26 = vpop.f32.mrb[5].mxu1 }
 0x91c   :  { %1310 = vtanh.f32 %v568_v25  ;;  %v1062_v28 = vmul.f32 -1.442695, %v568_v25 }
 0x91e   :  { %1312 = vpow2.f32 %v1062_v28 }
 0x926   :  { %v1311_v27 = vpop.eup %1310 }
 0x927   :  { %578 = vrot.lane.b32.xlu0 %v1311_v27, %s1377_s9 }
 0x928   :  { %v1313_v29 = vpop.eup %1312 }
 0x929   :  { %v572_v30 = vadd.f32 1.0, %v1313_v29 }
 0x92b   :  { %1314 = vrcp.f32 %v572_v30 }
 0x935   :  { %v1315_v31 = vpop.eup %1314 }
 0x936   :  { %v576_v35 = vmul.f32 %v1315_v31, %v479_v18  ;;  %v160_v18 = vadd.f32 %v1463_v13, %v1520_v62 }
 0x999   :  { %v579_v33 = vpop.permute.xlu0 %578 }
 0x99a   :  { %v581_v34 = vmul.f32 %v1315_v31, %v579_v33 }
 0x99c   :  { %583 = vrot.lane.b32.xlu1 %v581_v34, %s1378_s3 }
 0xa0e   :  { %v584_v36 = vpop.permute.xlu1 %583 }
 0xa0f   :  { %v586_v37 = vadd.f32 %v584_v36, %v576_v35 }
 0xa11   :  { %1316 = vtanh.f32 %v586_v37 }
 0xa1b   :  { %v1317_v38 = vpop.eup %1316 }
 0xa1c   :  { %589 = vrot.lane.b32.xlu0 %v1317_v38, %s1377_s9  ;;  %v165_v38 = vadd.f32 %v1518_v61, %v1463_v13 }
 0xa8e   :  { %v590_v39 = vpop.permute.xlu0 %589 }
 0xa8f   :  { %v1548_v40 = vmul.f32 %v1315_v31, %v590_v39 }
 0xa91   :  { %601 = vrot.lane.b32.xlu1 %v1548_v40, %s1378_s3 }
 0xb03   :  { %v602_v41 = vpop.permute.xlu1 %601 }
 0xb04   :  { %1190 = vmatmul.mubr.msk.f32.vlgmr.msra.gmra.mrb[10].mxu0 %vm173_vm2, %v602_v41 }
 0xb05   :  { %1267 = vmatpush3.bf16.msra.mxu0 %v1427_v7  ;;  %1211 = vmatprep.mubr.msk.f32.mxu0 %vm1375_vm1, %v1376_v10 }
 0xb06   :  { %1268 = vmatprep.subr.bf16.mxu0 %v1374_v3 }
 0xb09   :  { %1270 = vmatpush3.bf16.msra.mxu0 %v1442_v12 }
 0xbd7   :  { %v671_v43 = vpop.f32.mrb[10].mxu0 }
 0xbd8   :  { %v675_v44 = vadd.f32 %v671_v43, %v150_v42  ;;  %v1191_v45 = vpop.f32.mrb[11].mxu0  ;;  %v172_v43 = vld [vmem:[%s1626_s4] sm:$0xff]  ;;  %s1380_s4 = smov [#allocation2]  }
 0xbd9   :  { %vm272_vm3 = vcmp.eq.s32.totalorder %v172_v43, 1  ;;  %vm593_vm4 = vcmp.eq.s32.totalorder %v172_v43, 4  ;;  %vm807_vm5 = vcmp.eq.s32.totalorder %v172_v43, 6  ;;  %vm1021_vm6 = vcmp.eq.s32.totalorder %v172_v43, 8  ;;  %s1039_s23 = sshll.u32 %s1380_s4, 4  ;;  %s1040_s23 = int_to_ptr.vmem [resolvable:$true] %s1039_s23 }
 0xbda   :  { %1318 = vtanh.f32 %v675_v44  ;;  %v1064_v47 = vmul.f32 -1.442695, %v675_v44  ;;  %vm379_vm7 = vcmp.eq.s32.totalorder %v172_v43, 2  ;;  %vm486_vm8 = vcmp.eq.s32.totalorder %v172_v43, 3  ;;  %s1350_s24 = scalar_lea.vmem %s1040_s23, 128  ;;  %p1355_p1 = scmp.lt.s32.totalorder %s1040_s23, %s1040_s23 }
 0xbdb   :  { %vm700_vm9 = vcmp.eq.s32.totalorder %v172_v43, 5  ;;  %vm914_vm10 = vcmp.eq.s32.totalorder %v172_v43, 7  ;;  %p1351_p0 = scmp.ne.s32.totalorder %s1040_s23, %s1350_s24  ;;  %p1356_p2 = scmp.lt.s32.totalorder %s1350_s24, %s1350_s24 }
 0xbdc   :  { %1320 = vpow2.f32 %v1064_v47 }
 0xbdd   :  { %p1357_p3 = por %p1356_p2, %p1355_p1 }
 0xbdf   :  { %p1358_p4 = pnand %p1357_p3, %p1351_p0 }
 0xbe4   :  { %v1319_v46 = vpop.eup %1318 }
 0xbe5   :  { %685 = vrot.lane.b32.xlu0 %v1319_v46, %s1377_s9 }
 0xbe6   :  { %v1321_v48 = vpop.eup %1320 }
 0xbe7   :  { %v679_v49 = vadd.f32 1.0, %v1321_v48 }
 0xbe9   :  { %1322 = vrcp.f32 %v679_v49 }
 0xbf3   :  { %v1323_v50 = vpop.eup %1322 }
 0xbf4   :  { %v683_v53 = vmul.f32 %v1323_v50, %v586_v37  ;;  %v1379_v37 = vmov 0  }
 0xbf5   :  { %1284 = vset.pattern.permute.xlu0 %v1379_v37  ;;  %1285 = vset.pattern.permute.xlu1 %v1379_v37  ;;  %v273_v45 = vsel %vm272_vm3, 1, %v1379_v37  ;;  %v594_v46 = vsel %vm593_vm4, 1, %v1379_v37  ;;  %v808_v47 = vsel %vm807_vm5, 1, %v1379_v37  ;;  %v1022_v13 = vsel %vm1021_vm6, 1, %v1379_v37 }
 0xc57   :  { %v686_v51 = vpop.permute.xlu0 %685 }
 0xc58   :  { %v688_v52 = vmul.f32 %v1323_v50, %v686_v51 }
 0xc5a   :  { %690 = vrot.lane.b32.xlu1 %v688_v52, %s1378_s3 }
 0xccc   :  { %v691_v54 = vpop.permute.xlu1 %690 }
 0xccd   :  { %v693_v55 = vadd.f32 %v691_v54, %v683_v53  ;;  %v380_v53 = vsel %vm379_vm7, 1, %v1379_v37  ;;  %v487_v54 = vsel %vm486_vm8, 1, %v1379_v37 }
 0xccf   :  { %1324 = vtanh.f32 %v693_v55 }
 0xcd9   :  { %v1325_v57 = vpop.eup %1324 }
 0xcda   :  { %696 = vrot.lane.b32.xlu0 %v1325_v57, %s1377_s9  ;;  %v915_v57 = vsel %vm914_vm10, 1, %v1379_v37 }
 0xd4c   :  { %v697_v58 = vpop.permute.xlu0 %696 }
 0xd4d   :  { %v1563_v60 = vmul.f32 %v1323_v50, %v697_v58 }
 0xd4f   :  { %708 = vrot.lane.b32.xlu1 %v1563_v60, %s1378_s3 }
 0xdc1   :  { %v709_v63 = vpop.permute.xlu1 %708 }
 0xdc2   :  { %1201 = vmatmul.mubr.msk.f32.vlgmr.msra.gmra.mrb[6].mxu1 %vm173_vm2, %v709_v63 }
 0xdc3   :  { %1273 = vmatpush3.bf16.msra.mxu1 %v1427_v7  ;;  %1222 = vmatprep.mubr.msk.f32.mxu1 %vm1375_vm1, %v1376_v10 }
 0xdc4   :  { %1274 = vmatprep.subr.bf16.mxu1 %v1374_v3 }
 0xdc7   :  { %1276 = vmatpush3.bf16.msra.mxu1 %v1442_v12 }
 0xe95   :  { %v778_v1 = vpop.f32.mrb[6].mxu1 }
 0xe96   :  { %v782_v2 = vadd.f32 %v778_v1, %v155_v0  ;;  %v1202_v4 = vpop.f32.mrb[7].mxu1 }
 0xe98   :  { %1326 = vtanh.f32 %v782_v2  ;;  %v1066_v6 = vmul.f32 -1.442695, %v782_v2 }
 0xe9a   :  { %1328 = vpow2.f32 %v1066_v6 }
 0xea2   :  { %v1327_v5 = vpop.eup %1326 }
 0xea3   :  { %792 = vrot.lane.b32.xlu0 %v1327_v5, %s1377_s9 }
 0xea4   :  { %v1329_v7 = vpop.eup %1328 }
 0xea5   :  { %v786_v8 = vadd.f32 1.0, %v1329_v7 }
 0xea7   :  { %1330 = vrcp.f32 %v786_v8 }
 0xeb1   :  { %v1331_v10 = vpop.eup %1330 }
 0xeb2   :  { %v790_v12 = vmul.f32 %v1331_v10, %v693_v55  ;;  %v701_v55 = vsel %vm700_vm9, 1, %v1379_v37 }
 0xf15   :  { %v793_v9 = vpop.permute.xlu0 %792 }
 0xf16   :  { %v795_v3 = vmul.f32 %v1331_v10, %v793_v9 }
 0xf18   :  { %797 = vrot.lane.b32.xlu1 %v795_v3, %s1378_s3 }
 0xf8a   :  { %v798_v11 = vpop.permute.xlu1 %797 }
 0xf8b   :  { %v800_v59 = vadd.f32 %v798_v11, %v790_v12 }
 0xf8d   :  { %1332 = vtanh.f32 %v800_v59 }
 0xf97   :  { %v1333_v14 = vpop.eup %1332 }
 0xf98   :  { %803 = vrot.lane.b32.xlu0 %v1333_v14, %s1377_s9 }
0x100a   :  { %v804_v15 = vpop.permute.xlu0 %803 }
0x100b   :  { %v1578_v16 = vmul.f32 %v1331_v10, %v804_v15 }
0x100d   :  { %815 = vrot.lane.b32.xlu1 %v1578_v16, %s1378_s3 }
0x107f   :  { %v816_v17 = vpop.permute.xlu1 %815 }
0x1080   :  { %1212 = vmatmul.mubr.msk.f32.vlgmr.msra.gmra.mrb[12].mxu0 %vm173_vm2, %v816_v17 }
0x1153   :  { %v885_v19 = vpop.f32.mrb[12].mxu0 }
0x1154   :  { %v889_v20 = vadd.f32 %v885_v19, %v160_v18  ;;  %v1213_v22 = vpop.f32.mrb[13].mxu0 }
0x1156   :  { %1334 = vtanh.f32 %v889_v20  ;;  %v1068_v24 = vmul.f32 -1.442695, %v889_v20 }
0x1158   :  { %1336 = vpow2.f32 %v1068_v24 }
0x1160   :  { %v1335_v23 = vpop.eup %1334 }
0x1161   :  { %899 = vrot.lane.b32.xlu0 %v1335_v23, %s1377_s9 }
0x1162   :  { %v1337_v25 = vpop.eup %1336 }
0x1163   :  { %v893_v26 = vadd.f32 1.0, %v1337_v25 }
0x1165   :  { %1338 = vrcp.f32 %v893_v26 }
0x116f   :  { %v1339_v27 = vpop.eup %1338 }
0x1170   :  { %v897_v30 = vmul.f32 %v1339_v27, %v800_v59 }
0x11d3   :  { %v900_v28 = vpop.permute.xlu0 %899 }
0x11d4   :  { %v902_v29 = vmul.f32 %v1339_v27, %v900_v28 }
0x11d6   :  { %904 = vrot.lane.b32.xlu1 %v902_v29, %s1378_s3 }
0x1248   :  { %v905_v31 = vpop.permute.xlu1 %904 }
0x1249   :  { %v907_v62 = vadd.f32 %v905_v31, %v897_v30 }
0x124b   :  { %1340 = vtanh.f32 %v907_v62 }
0x1255   :  { %v1341_v33 = vpop.eup %1340 }
0x1256   :  { %910 = vrot.lane.b32.xlu0 %v1341_v33, %s1377_s9 }
0x12c8   :  { %v911_v34 = vpop.permute.xlu0 %910 }
0x12c9   :  { %v1588_v35 = vmul.f32 %v1339_v27, %v911_v34 }
0x12cb   :  { %922 = vrot.lane.b32.xlu1 %v1588_v35, %s1378_s3 }
0x133d   :  { %v923_v36 = vpop.permute.xlu1 %922 }
0x133e   :  { %1223 = vmatmul.mubr.msk.f32.vlgmr.msra.gmra.mrb[8].mxu1 %vm173_vm2, %v923_v36 }
0x1411   :  { %v992_v39 = vpop.f32.mrb[8].mxu1 }
0x1412   :  { %v996_v41 = vadd.f32 %v992_v39, %v165_v38  ;;  %v1224_v42 = vpop.f32.mrb[9].mxu1 }
0x1414   :  { %1342 = vtanh.f32 %v996_v41  ;;  %v1070_v61 = vmul.f32 -1.442695, %v996_v41 }
0x1416   :  { %1344 = vpow2.f32 %v1070_v61 }
0x141e   :  { %v1343_v44 = vpop.eup %1342 }
0x141f   :  { %1006 = vrot.lane.b32.xlu0 %v1343_v44, %s1377_s9 }
0x1420   :  { %v1345_v48 = vpop.eup %1344 }
0x1421   :  { %v1000_v49 = vadd.f32 1.0, %v1345_v48 }
0x1423   :  { %275 = vperm.xlu0 %1284, %v273_v45   ;;  %1346 = vrcp.f32 %v1000_v49 }
0x1427   :  { %596 = vperm.xlu0 %1284, %v594_v46  }
0x142b   :  { %810 = vperm.xlu0 %1284, %v808_v47  }
0x142d   :  { %v1347_v50 = vpop.eup %1346 }
0x142e   :  { %v1004_v58 = vmul.f32 %v1347_v50, %v907_v62 }
0x142f   :  { %1024 = vperm.xlu0 %1284, %v1022_v13  }
0x1491   :  { %v1007_v51 = vpop.permute.xlu0 %1006 }
0x1492   :  { %v1009_v52 = vmul.f32 %v1347_v50, %v1007_v51 }
0x1494   :  { %1011 = vrot.lane.b32.xlu1 %v1009_v52, %s1378_s3 }
0x1498   :  { %382 = vperm.xlu1 %1285, %v380_v53  }
0x149c   :  { %489 = vperm.xlu1 %1285, %v487_v54  }
0x14a0   :  { %703 = vperm.xlu1 %1285, %v701_v55  }
0x14a2   :  { %v276_v5 = vpop.permute.xlu0 %275 }
0x14a3   :  { %vm277_vm11 = vcmp.eq.s32.totalorder %v276_v5, 1 }
0x14a4   :  { %917 = vperm.xlu1 %1285, %v915_v57   ;;  %v278_v8 = vsel %vm277_vm11, %v1469_v32, 0.0 }
0x14a6   :  { %v597_v6 = vpop.permute.xlu0 %596 }
0x14a7   :  { %vm598_vm14 = vcmp.eq.s32.totalorder %v597_v6, 1 }
0x14aa   :  { %v811_v3 = vpop.permute.xlu0 %810 }
0x14ab   :  { %vm812_vm0 = vcmp.eq.s32.totalorder %v811_v3, 1 }
0x14ae   :  { %v1025_v14 = vpop.permute.xlu0 %1024 }
0x14af   :  { %vm1026_vm3 = vcmp.eq.s32.totalorder %v1025_v14, 1 }
0x1506   :  { %v1012_v63 = vpop.permute.xlu1 %1011 }
0x1507   :  { %v1014_v0 = vadd.f32 %v1012_v63, %v1004_v58 }
0x1509   :  { %1348 = vtanh.f32 %v1014_v0 }
0x1513   :  { %v1349_v1 = vpop.eup %1348 }
0x1514   :  { %1017 = vrot.lane.b32.xlu1 %v1349_v1, %s1377_s9 }
0x1517   :  { %v383_v2 = vpop.permute.xlu1 %382 }
0x1518   :  { %vm384_vm12 = vcmp.eq.s32.totalorder %v383_v2, 1 }
0x1519   :  { %v385_v10 = vsel %vm384_vm12, %v1510_v56, %v278_v8 }
0x151b   :  { %v490_v4 = vpop.permute.xlu1 %489 }
0x151c   :  { %vm491_vm13 = vcmp.eq.s32.totalorder %v490_v4, 1 }
0x151d   :  { %v492_v9 = vsel %vm491_vm13, %v1533_v21, %v385_v10 }
0x151e   :  { %v599_v11 = vsel %vm598_vm14, %v1548_v40, %v492_v9 }
0x151f   :  { %v704_v7 = vpop.permute.xlu1 %703 }
0x1520   :  { %vm705_vm15 = vcmp.eq.s32.totalorder %v704_v7, 1 }
0x1521   :  { %v706_v59 = vsel %vm705_vm15, %v1563_v60, %v599_v11 }
0x1522   :  { %v813_v17 = vsel %vm812_vm0, %v1578_v16, %v706_v59 }
0x1523   :  { %v918_v12 = vpop.permute.xlu1 %917 }
0x1524   :  { %vm919_vm1 = vcmp.eq.s32.totalorder %v918_v12, 1 }
0x1525   :  { %v920_v32 = vsel %vm919_vm1, %v1588_v35, %v813_v17 }
0x1586   :  { %v1018_v15 = vpop.permute.xlu1 %1017 }
0x1587   :  { %v1020_v18 = vmul.f32 %v1347_v50, %v1018_v15 }
0x1589   :  { %v1027_v56 = vsel %vm1026_vm3, %v1020_v18, %v920_v32 }
0x158a   :  { %1029 = vrot.lane.b32.xlu0 %v1027_v56, %s1378_s3 }
0x15fc   :  { %v1030_v21 = vpop.permute.xlu0 %1029 }
0x15fd   :  { %1032 = vst.msk [vmem:[#allocation2] sm:$0xff] %vm173_vm2, %v1030_v21 }
0x15fe   :  { %1361 = shalt.err (!%p1358_p4)
}
0x15ff   :  { %s1362_s27 = scalar_lea.hbm %s1627_s5, 128 }
0x1600   :  { %p1363_p5 = scmp.ne.s32.totalorder %s1627_s5, %s1362_s27  ;;  %p1366_p6 = scmp.lt.u32.totalorder %s1362_s27, %s1627_s5 }
0x1602   :  { %p1368_p7 = pnand %p1366_p6, %p1363_p5 }
0x1604   :  { %1371 = shalt.err (!%p1368_p7)
}
0x1605   :  { %1042 = dma.vmem_to_hbm [thread:$0]  %s1040_s23, 128, %s1627_s5, [#allocation3]  }
0x1606   :  { %1372 = dma.done.wait [#allocation3], 128  }
0x1607   :  { %1373 = vsyncadd [#allocation3], 4294967168 }
0x1608   :  { %1046 = vsyncpa [#allocation3], 1 }

</bundles_post_ra>
